<compile_context>
chip_gen: v6e
topology: v6e:2x2x1
jax: 0.10.0
libtpu: 0.0.40
codegen_flags: <defaults>
</compile_context>

<pallas_src>
import functools

import jax
import jax.numpy as jnp
from jax.experimental import pallas as pl
from jax.experimental.pallas import tpu as pltpu


def _round_up(x: int, m: int) -> int:
    return (x + m - 1) // m * m


def _gelu_exact(x):
    # Exact (erf-based) GELU in f32, matching torch.nn.functional.gelu default.
    return 0.5 * x * (1.0 + jax.lax.erf(x * 0.7071067811865476))


# ---------------------------------------------------------------------------
# Kernel bodies
# ---------------------------------------------------------------------------

def _decoder_kernel_fused(x_ref, w1_ref, b1_ref, w2_ref, b2_ref, w3_ref, b3_ref, o_ref):
    """Small-E path: sub-pixels fused into the lane dim; three wide matmuls.

    x_ref : [tm, E]          bf16   token embeddings (one M tile)
    w1_ref: [E, U*E]         bf16   fused up-conv weight (per-sub-pixel lane bands)
    b1_ref: [1, U*E]         f32
    w2_ref: [U*E, U*E]       bf16   block-diagonal proj weight
    b2_ref: [1, U*E]         f32
    w3_ref: [U*E, Wpad]      bf16   block-diag patch-decoder weight (zero lane pad)
    b3_ref: [1, Wpad]        f32
    o_ref : [tm, Wpad]       bf16   packed output (ab lane bands of width N3)
    """
    h = jnp.dot(x_ref[...], w1_ref[...], preferred_element_type=jnp.float32) + b1_ref[...]
    h = _gelu_exact(h)
    h = jnp.dot(h.astype(jnp.bfloat16), w2_ref[...], preferred_element_type=jnp.float32) + b2_ref[...]
    h = _gelu_exact(h)
    h = jnp.dot(h.astype(jnp.bfloat16), w3_ref[...], preferred_element_type=jnp.float32) + b3_ref[...]
    o_ref[...] = h.astype(o_ref.dtype)


def _make_loop_kernel(U: int, E: int, N3: int):
    """Large-E path: stage 1 is ONE fused matmul; stages 2/3 loop over sub-pixels."""

    def kernel(x_ref, w1_ref, b1_ref, w2_ref, b2_ref, w3_ref, b3_ref, o_ref):
        tm = x_ref.shape[0]
        # Stage 1: all U sub-pixels in one [tm,E] @ [E,U*E] matmul + GELU.
        h1 = jnp.dot(x_ref[...], w1_ref[...], preferred_element_type=jnp.float32) + b1_ref[...]
        h1 = _gelu_exact(h1).astype(jnp.bfloat16)           # [tm, U*E]
        w2 = w2_ref[...]
        w3 = w3_ref[...]
        # Hoist bias broadcasts out of the unrolled loop (JAX does not CSE them).
        b2 = jnp.broadcast_to(b2_ref[...], (tm, E))
        b3 = jnp.broadcast_to(b3_ref[...], (tm, N3))
        for ab in range(U):                                  # static unroll, U is small
            h = jnp.dot(h1[:, ab * E:(ab + 1) * E], w2, preferred_element_type=jnp.float32) + b2
            h = _gelu_exact(h)
            y = jnp.dot(h.astype(jnp.bfloat16), w3, preferred_element_type=jnp.float32) + b3
            o_ref[:, ab * N3:(ab + 1) * N3] = y.astype(o_ref.dtype)
        pad = o_ref.shape[-1] - U * N3
        if pad:                                              # keep pad lanes defined
            o_ref[:, U * N3:] = jnp.zeros((tm, pad), o_ref.dtype)

    return kernel


# ---------------------------------------------------------------------------
# VMEM-aware tiling
# ---------------------------------------------------------------------------

def _vmem_capacity_bytes() -> int:
    try:
        return int(pltpu.get_tpu_info().vmem_capacity_bytes)
    except Exception:
        return 64 * 1024 * 1024     # conservative fallback (v7x per-core VMEM)


def _pick_tile_m(M, E, U, wpad, weight_bytes, *, vmem_bytes):
    """Token-tile size against a generation-aware VMEM budget; >= 2 grid steps."""
    budget = int(vmem_bytes * 0.75)                 # headroom for compiler scratch
    resident = 2 * weight_bytes                     # Pallas double-buffers every input

    def step_bytes(tm):
        x_b = 2 * tm * E * 2                        # 2x-buffered bf16 input tile
        o_b = 2 * tm * wpad * 2                     # 2x-buffered bf16 output tile
        tmp = tm * (2 * U * E + wpad) * 4           # rough in-kernel f32 temporaries
        return x_b + o_b + tmp

    tm = 1024
    while tm > 8 and resident + step_bytes(tm) > budget:
        tm //= 2
    tm = max(8, tm)
    # >= 2 grid steps so the "parallel" axis can span v7x's 2 TensorCores, and
    # rebalance so the M tail padding stays below one sublane tile per step.
    g = max(2, pl.cdiv(M, tm))
    return max(8, _round_up(pl.cdiv(M, g), 8))


# ---------------------------------------------------------------------------
# Parameters & forward
# ---------------------------------------------------------------------------

def init_params(key, *, embed_dim, out_channels, patch_size, upsample, init_std=0.02):
    """Deterministic synthetic parameters matching the PyTorch module's shapes."""
    ph, pw = patch_size
    uh, uw = upsample
    k1, k2, k3, k4, k5, k6 = jax.random.split(key, 6)
    return {
        # nn.ConvTranspose2d(E, E, upsample, upsample): weight (in, out, kh, kw)
        "w_up": jax.random.normal(k1, (embed_dim, embed_dim, uh, uw), jnp.float32) * init_std,
        "b_up": jax.random.normal(k4, (embed_dim,), jnp.float32) * init_std,
        # nn.Linear(E, E): weight (out, in)
        "w_proj": jax.random.normal(k2, (embed_dim, embed_dim), jnp.float32) * init_std,
        "b_proj": jax.random.normal(k5, (embed_dim,), jnp.float32) * init_std,
        # PatchDecoder ~ ConvTranspose2d(E, C, patch_size, patch_size): weight (in, out, ph, pw)
        "w_dec": jax.random.normal(k3, (embed_dim, out_channels, ph, pw), jnp.float32) * init_std,
        "b_dec": jax.random.normal(k6, (out_channels,), jnp.float32) * init_std,
    }


def lightweight_decoder_forward(params, latents, *, n_patches, patch_size, upsample, out_channels):
    """latents: [B, n_patches, embed_dim]  ->  image: [B, out_channels, H, W] (NCHW)."""
    B, N, E = latents.shape
    nh, nw = n_patches
    uh, uw = upsample
    ph, pw = patch_size
    C = out_channels
    U = uh * uw
    assert N == nh * nw
    N3 = C * ph * pw                 # per-sub-pixel patch pixels
    Wtot = U * N3                    # packed output width (all sub-pixels, one token)
    Wpad = _round_up(Wtot, 128)      # lane-dense (unmasked) stores

    # ---- trace-time weight prep (pure layout, folded by XLA; bf16 halves HBM/VMEM) ----
    # Up-conv (E_in, E_out, uh, uw) -> fused [E_in, U*E_out]: one matmul for all sub-pixels.
    w1 = params["w_up"].transpose(2, 3, 0, 1).reshape(U, E, E)            # [ab, e_in, e_out]
    w1f = w1.transpose(1, 0, 2).reshape(E, U * E).astype(jnp.bfloat16)
    b1f = jnp.tile(params["b_up"], U).reshape(1, U * E).astype(jnp.float32)
    # proj Linear: torch weight is (out, in); y = x @ W.T + b.
    w2t = params["w_proj"].T
    b2v = params["b_proj"]
    # TODO(synk): PatchDecoder source not provided; assumed ConvTranspose2d(E, C, patch, patch)
    # (per-token linear E -> C*ph*pw, no trailing activation).
    w3m = params["w_dec"].reshape(E, N3)
    b3v = jnp.broadcast_to(params["b_dec"][:, None, None], (C, ph, pw)).reshape(N3)

    fuse_subpixels = (U * E) <= 512   # small E: block-diag stages 2/3 -> lane-wide matmuls
    if fuse_subpixels:
        eye = jnp.eye(U, dtype=w2t.dtype)
        w2p = jnp.kron(eye, w2t).astype(jnp.bfloat16)                      # [U*E, U*E]
        b2p = jnp.tile(b2v, U).reshape(1, U * E).astype(jnp.float32)
        w3p = jnp.kron(eye, w3m)                                           # [U*E, U*N3]
        w3p = jnp.pad(w3p, ((0, 0), (0, Wpad - Wtot))).astype(jnp.bfloat16)
        b3p = jnp.pad(jnp.tile(b3v, U), (0, Wpad - Wtot)).reshape(1, Wpad).astype(jnp.float32)
        kernel = _decoder_kernel_fused
    else:
        w2p = w2t.astype(jnp.bfloat16)                                     # [E, E]
        b2p = b2v.reshape(1, E).astype(jnp.float32)
        w3p = w3m.astype(jnp.bfloat16)                                     # [E, N3]
        b3p = b3v.reshape(1, N3).astype(jnp.float32)
        kernel = _make_loop_kernel(U, E, N3)

    weights = (w1f, b1f, w2p, b2p, w3p, b3p)
    weight_bytes = sum(int(w.size) * w.dtype.itemsize for w in weights)

    # ---- token slab, tiled over M (>= 2 parallel grid steps, VMEM-budgeted tiles) ----
    M = B * N
    vmem_cap = _vmem_capacity_bytes()
    tm = _pick_tile_m(M, E, U, Wpad, weight_bytes, vmem_bytes=vmem_cap)
    Mp = _round_up(M, tm)
    x = latents.reshape(M, E)
    if Mp != M:
        x = jnp.pad(x, ((0, Mp - M), (0, 0)))
    x = x.astype(jnp.bfloat16)

    grid = (Mp // tm,)
    out = pl.pallas_call(
        kernel,
        out_shape=jax.ShapeDtypeStruct((Mp, Wpad), jnp.bfloat16),
        grid_spec=pltpu.PrefetchScalarGridSpec(
            num_scalar_prefetch=0,
            grid=grid,
            in_specs=[
                pl.BlockSpec((tm, E), lambda i: (i, 0)),        # streamed token tile
                pl.BlockSpec(w1f.shape, lambda i: (0, 0)),      # resident bf16 weights
                pl.BlockSpec(b1f.shape, lambda i: (0, 0)),
                pl.BlockSpec(w2p.shape, lambda i: (0, 0)),
                pl.BlockSpec(b2p.shape, lambda i: (0, 0)),
                pl.BlockSpec(w3p.shape, lambda i: (0, 0)),
                pl.BlockSpec(b3p.shape, lambda i: (0, 0)),
            ],
            out_specs=pl.BlockSpec((tm, Wpad), lambda i: (i, 0)),
        ),
        compiler_params=pltpu.CompilerParams(
            dimension_semantics=("parallel",),
            vmem_limit_bytes=min(int(vmem_cap * 0.85), 100 * 1024 * 1024),
        ),
    )(x, *weights)

    # ---- single final NCHW assembly (only layout op in the whole pipeline) ----
    # rows: token (B, nh, nw); cols: (sub-pixel a, b, C, ph, pw), lane-packed.
    y = out[:M, :Wtot].reshape(B, nh, nw, uh, uw, C, ph, pw)
    img = y.transpose(0, 5, 1, 3, 6, 2, 4, 7)   # -> (B, C, nh, uh, ph, nw, uw, pw)
    return img.reshape(B, C, nh * uh * ph, nw * uw * pw).astype(jnp.float32)


def reference_forward(params, latents, *, n_patches, patch_size, upsample, out_channels):
    """Pure-jnp f32 reference mirroring the PyTorch module (for correctness checking)."""
    B, N, E = latents.shape
    nh, nw = n_patches
    uh, uw = upsample
    ph, pw = patch_size
    C = out_channels
    Hp, Wp = nh * uh, nw * uw

    w_up2d = params["w_up"].reshape(E, E * uh * uw)
    b_up2d = jnp.broadcast_to(params["b_up"][:, None, None], (E, uh, uw)).reshape(E * uh * uw)
    y1 = _gelu_exact(latents.reshape(B * N, E) @ w_up2d + b_up2d)
    y1 = y1.reshape(B, nh, nw, E, uh, uw).transpose(0, 1, 4, 2, 5, 3).reshape(B * Hp * Wp, E)

    y2 = _gelu_exact(y1 @ params["w_proj"].T + params["b_proj"])

    w_dec2d = params["w_dec"].reshape(E, C * ph * pw)
    b_dec2d = jnp.broadcast_to(params["b_dec"][:, None, None], (C, ph, pw)).reshape(C * ph * pw)
    y3 = y2 @ w_dec2d + b_dec2d
    return y3.reshape(B, Hp, Wp, C, ph, pw).transpose(0, 3, 1, 4, 2, 5).reshape(B, C, Hp * ph, Wp * pw)


if __name__ == "__main__":
    # Small, module-consistent shapes.
    B = 2
    n_patches = (4, 4)        # 16 patches
    patch_size = (4, 4)
    embed_dim = 32
    out_channels = 3
    upsample = (2, 2)

    key = jax.random.PRNGKey(0)
    kp, kx = jax.random.split(key)
    params = init_params(
        kp, embed_dim=embed_dim, out_channels=out_channels,
        patch_size=patch_size, upsample=upsample,
    )
    latents = jax.random.normal(kx, (B, n_patches[0] * n_patches[1], embed_dim), jnp.float32)

    fwd = jax.jit(functools.partial(
        lightweight_decoder_forward,
        n_patches=n_patches, patch_size=patch_size,
        upsample=upsample, out_channels=out_channels,
    ))
    out = jax.block_until_ready(fwd(params, latents))

    H = n_patches[0] * upsample[0] * patch_size[0]
    W = n_patches[1] * upsample[1] * patch_size[1]
    assert out.shape == (B, out_channels, H, W), out.shape

    ref = reference_forward(
        params, latents,
        n_patches=n_patches, patch_size=patch_size,
        upsample=upsample, out_channels=out_channels,
    )
    # bf16 matmul inputs + bf16 output with f32 MXU accumulation -> small drift vs f32 ref.
    max_err = float(jnp.max(jnp.abs(out - ref)))
    assert jnp.allclose(out, ref, atol=2e-3, rtol=2e-2), max_err

    print("KERNEL_OK")
</pallas_src>

<mosaic_0001>
module attributes {stable_mosaic.version = 11 : i64} {
  func.func @_decoder_kernel_fused(%arg0: i32, %arg1: memref<16x32xbf16, #tpu.memory_space<vmem>>, %arg2: memref<32x128xbf16, #tpu.memory_space<vmem>>, %arg3: memref<1x128xf32, #tpu.memory_space<vmem>>, %arg4: memref<128x128xbf16, #tpu.memory_space<vmem>>, %arg5: memref<1x128xf32, #tpu.memory_space<vmem>>, %arg6: memref<128x256xbf16, #tpu.memory_space<vmem>>, %arg7: memref<1x256xf32, #tpu.memory_space<vmem>>, %arg8: memref<16x256xbf16, #tpu.memory_space<vmem>>) attributes {dimension_semantics = [#tpu.dimension_semantics<parallel>], iteration_bounds = array<i64: 2>, scalar_prefetch = 0 : i64, scratch_operands = 0 : i64, tpu.core_type = #tpu.core_type<tc>, window_params = [{transform_indices = @transform_0, window_bounds = array<i64: 16, 32>}, {pipeline_mode = #tpu.pipeline_mode<synchronous>, transform_indices = @transform_1, window_bounds = array<i64: 32, 128>}, {pipeline_mode = #tpu.pipeline_mode<synchronous>, transform_indices = @transform_2, window_bounds = array<i64: 1, 128>}, {pipeline_mode = #tpu.pipeline_mode<synchronous>, transform_indices = @transform_3, window_bounds = array<i64: 128, 128>}, {pipeline_mode = #tpu.pipeline_mode<synchronous>, transform_indices = @transform_4, window_bounds = array<i64: 1, 128>}, {pipeline_mode = #tpu.pipeline_mode<synchronous>, transform_indices = @transform_5, window_bounds = array<i64: 128, 256>}, {pipeline_mode = #tpu.pipeline_mode<synchronous>, transform_indices = @transform_6, window_bounds = array<i64: 1, 256>}, {transform_indices = @transform_7, window_bounds = array<i64: 16, 256>}]} {
    %c0 = arith.constant 0 : index
    %c0_0 = arith.constant 0 : index
    %0 = vector.load %arg1[%c0, %c0_0] : memref<16x32xbf16, #tpu.memory_space<vmem>>, vector<16x32xbf16>
    %c0_1 = arith.constant 0 : index
    %c0_2 = arith.constant 0 : index
    %1 = vector.load %arg2[%c0_1, %c0_2] : memref<32x128xbf16, #tpu.memory_space<vmem>>, vector<32x128xbf16>
    %cst = arith.constant dense<0.000000e+00> : vector<16x128xf32>
    %2 = tpu.matmul %0, %1, %cst {dimension_numbers = #tpu.dot_dimension_numbers<[1], [0], [0], [1], [0, 0, 1, 1], [], []>} : vector<16x32xbf16>, vector<32x128xbf16>, vector<16x128xf32> -> vector<16x128xf32>
    %c0_3 = arith.constant 0 : index
    %c0_4 = arith.constant 0 : index
    %3 = vector.load %arg3[%c0_3, %c0_4] : memref<1x128xf32, #tpu.memory_space<vmem>>, vector<1x128xf32>
    %4 = vector.broadcast %3 : vector<1x128xf32> to vector<16x128xf32>
    %5 = arith.addf %2, %4 : vector<16x128xf32>
    %cst_5 = arith.constant 5.000000e-01 : f32
    %6 = vector.broadcast %cst_5 : f32 to vector<16x128xf32>
    %7 = arith.mulf %6, %5 : vector<16x128xf32>
    %cst_6 = arith.constant 0.707106769 : f32
    %8 = vector.broadcast %cst_6 : f32 to vector<16x128xf32>
    %9 = arith.mulf %5, %8 : vector<16x128xf32>
    %10 = math.erf %9 : vector<16x128xf32>
    %cst_7 = arith.constant 1.000000e+00 : f32
    %11 = vector.broadcast %cst_7 : f32 to vector<16x128xf32>
    %12 = arith.addf %11, %10 : vector<16x128xf32>
    %13 = arith.mulf %7, %12 : vector<16x128xf32>
    %14 = arith.truncf %13 : vector<16x128xf32> to vector<16x128xbf16>
    %c0_8 = arith.constant 0 : index
    %c0_9 = arith.constant 0 : index
    %15 = vector.load %arg4[%c0_8, %c0_9] : memref<128x128xbf16, #tpu.memory_space<vmem>>, vector<128x128xbf16>
    %cst_10 = arith.constant dense<0.000000e+00> : vector<16x128xf32>
    %16 = tpu.matmul %14, %15, %cst_10 {dimension_numbers = #tpu.dot_dimension_numbers<[1], [0], [0], [1], [0, 0, 1, 1], [], []>} : vector<16x128xbf16>, vector<128x128xbf16>, vector<16x128xf32> -> vector<16x128xf32>
    %c0_11 = arith.constant 0 : index
    %c0_12 = arith.constant 0 : index
    %17 = vector.load %arg5[%c0_11, %c0_12] : memref<1x128xf32, #tpu.memory_space<vmem>>, vector<1x128xf32>
    %18 = vector.broadcast %17 : vector<1x128xf32> to vector<16x128xf32>
    %19 = arith.addf %16, %18 : vector<16x128xf32>
    %cst_13 = arith.constant 5.000000e-01 : f32
    %20 = vector.broadcast %cst_13 : f32 to vector<16x128xf32>
    %21 = arith.mulf %20, %19 : vector<16x128xf32>
    %cst_14 = arith.constant 0.707106769 : f32
    %22 = vector.broadcast %cst_14 : f32 to vector<16x128xf32>
    %23 = arith.mulf %19, %22 : vector<16x128xf32>
    %24 = math.erf %23 : vector<16x128xf32>
    %cst_15 = arith.constant 1.000000e+00 : f32
    %25 = vector.broadcast %cst_15 : f32 to vector<16x128xf32>
    %26 = arith.addf %25, %24 : vector<16x128xf32>
    %27 = arith.mulf %21, %26 : vector<16x128xf32>
    %28 = arith.truncf %27 : vector<16x128xf32> to vector<16x128xbf16>
    %c0_16 = arith.constant 0 : index
    %c0_17 = arith.constant 0 : index
    %29 = vector.load %arg6[%c0_16, %c0_17] : memref<128x256xbf16, #tpu.memory_space<vmem>>, vector<128x256xbf16>
    %cst_18 = arith.constant dense<0.000000e+00> : vector<16x256xf32>
    %30 = tpu.matmul %28, %29, %cst_18 {dimension_numbers = #tpu.dot_dimension_numbers<[1], [0], [0], [1], [0, 0, 1, 1], [], []>} : vector<16x128xbf16>, vector<128x256xbf16>, vector<16x256xf32> -> vector<16x256xf32>
    %c0_19 = arith.constant 0 : index
    %c0_20 = arith.constant 0 : index
    %31 = vector.load %arg7[%c0_19, %c0_20] : memref<1x256xf32, #tpu.memory_space<vmem>>, vector<1x256xf32>
    %32 = vector.broadcast %31 : vector<1x256xf32> to vector<16x256xf32>
    %33 = arith.addf %30, %32 : vector<16x256xf32>
    %34 = arith.truncf %33 : vector<16x256xf32> to vector<16x256xbf16>
    %c0_21 = arith.constant 0 : index
    %c0_22 = arith.constant 0 : index
    %35 = vector.load %arg8[%c0_21, %c0_22] : memref<16x256xbf16, #tpu.memory_space<vmem>>, vector<16x256xbf16>
    tpu.vector_store %arg8[%c0_21, %c0_22], %34 {strides = array<i32>} : memref<16x256xbf16, #tpu.memory_space<vmem>>, vector<16x256xbf16>,
    return
  }
  func.func @transform_0(%arg0: i32) -> (i32, i32) {
    %c0_i32 = arith.constant 0 : i32
    %c0_i32_0 = arith.constant 0 : i32
    return %arg0, %c0_i32 : i32, i32
  }
  func.func @transform_1(%arg0: i32) -> (i32, i32) {
    %c0_i32 = arith.constant 0 : i32
    %c0_i32_0 = arith.constant 0 : i32
    %c0_i32_1 = arith.constant 0 : i32
    return %c0_i32, %c0_i32_0 : i32, i32
  }
  func.func @transform_2(%arg0: i32) -> (i32, i32) {
    %c0_i32 = arith.constant 0 : i32
    %c0_i32_0 = arith.constant 0 : i32
    %c0_i32_1 = arith.constant 0 : i32
    return %c0_i32, %c0_i32_0 : i32, i32
  }
  func.func @transform_3(%arg0: i32) -> (i32, i32) {
    %c0_i32 = arith.constant 0 : i32
    %c0_i32_0 = arith.constant 0 : i32
    %c0_i32_1 = arith.constant 0 : i32
    return %c0_i32, %c0_i32_0 : i32, i32
  }
  func.func @transform_4(%arg0: i32) -> (i32, i32) {
    %c0_i32 = arith.constant 0 : i32
    %c0_i32_0 = arith.constant 0 : i32
    %c0_i32_1 = arith.constant 0 : i32
    return %c0_i32, %c0_i32_0 : i32, i32
  }
  func.func @transform_5(%arg0: i32) -> (i32, i32) {
    %c0_i32 = arith.constant 0 : i32
    %c0_i32_0 = arith.constant 0 : i32
    %c0_i32_1 = arith.constant 0 : i32
    return %c0_i32, %c0_i32_0 : i32, i32
  }
  func.func @transform_6(%arg0: i32) -> (i32, i32) {
    %c0_i32 = arith.constant 0 : i32
    %c0_i32_0 = arith.constant 0 : i32
    %c0_i32_1 = arith.constant 0 : i32
    return %c0_i32, %c0_i32_0 : i32, i32
  }
  func.func @transform_7(%arg0: i32) -> (i32, i32) {
    %c0_i32 = arith.constant 0 : i32
    %c0_i32_0 = arith.constant 0 : i32
    return %arg0, %c0_i32 : i32, i32
  }
}

</mosaic_0001>

<bundles_post_ra>
// kernel: tile.22
= control target key start
LH: loop header
LB: loop body
LE: loop exit
PB: predicated region body
PF: predicated region fallthrough
CT: control target
= control target key end

     0   :  { %s22_s0 = inlined_call_operand.vmem [shape: f32[32], index: 0, kind: input, shape index: {}]   ;;  %s23_s1 = inlined_call_operand.vmem [shape: f32[4,32], index: 1, kind: output, shape index: {}]  }
   0x1   :  { %v4_v0 = vld [vmem:[%s22_s0] ss:$0 sm:$0xff] }
   0x2   :  { %5 = vst [vmem:[%s23_s1] sm:$0xf] %v4_v0 }

// kernel: tile.23
= control target key start
LH: loop header
LB: loop body
LE: loop exit
PB: predicated region body
PF: predicated region fallthrough
CT: control target
= control target key end

     0   :  { %vm8_vm0 = vcmask 261120   ;;  %s40_s8 = smov 32   ;;  %s41_s9 = smov 64   ;;  %vm14_vm1 = vcmask 1048320   ;;  %vm20_vm2 = vcmask 785920   ;;  %vm26_vm3 = vcmask 523520   ;;  %s58_s0 = inlined_call_operand.vmem [shape: f32[4,32], index: 0, kind: input, shape index: {}]   ;;  %s59_s1 = inlined_call_operand.vmem [shape: f32[1,128], index: 1, kind: output, shape index: {}]  }
   0x1   :  { %v5_v0 = vld [vmem:[%s58_s0] sm:$0xf]  ;;  %s39_s0 = smov 96  }
   0x2   :  { %6 = vst [vmem:[#allocation1] sm:$0xf] %v5_v0 }
   0x9   :  { %v11_v1 = vld [vmem:[#allocation1 + $0x3] sm:$0x1]   ;;  %v23_v2 = vld [vmem:[#allocation1 + $0x1] sm:$0x1]   ;;  %v7_v3 = vld [vmem:[#allocation1] sm:$0x1]  }
   0xa   :  { %12 = vrot.lane.b32.xlu0 %v11_v1, %s39_s0  ;;  %24 = vrot.lane.b32.xlu1 %v23_v2, %s40_s8  ;;  %v17_v4 = vld [vmem:[#allocation1 + $0x2] sm:$0x1]   ;;  %9 = vst.msk [vmem:[#allocation0] sm:$0x1] %vm8_vm0, %v7_v3  }
   0xe   :  { %18 = vrot.lane.b32.xlu0 %v17_v4, %s41_s9 }
  0x7c   :  { %v13_v5 = vpop.permute.xlu0 %12   ;;  %v25_v6 = vpop.permute.xlu1 %24  }
  0x7d   :  { %15 = vst.msk [vmem:[#allocation0] sm:$0x1] %vm14_vm1, %v13_v5  }
  0x80   :  { %v19_v7 = vpop.permute.xlu0 %18  }
  0x81   :  { %21 = vst.msk [vmem:[#allocation0] sm:$0x1] %vm20_vm2, %v19_v7  }
  0x82   :  { %27 = vst.msk [vmem:[#allocation0] sm:$0x1] %vm26_vm3, %v25_v6  }
  0x89   :  { %v32_v8 = vld [vmem:[#allocation0] sm:$0x1] }
  0x8a   :  { %35 = vst [vmem:[%s59_s1] sm:$0x1] %v32_v8 }

// kernel: tile.26
= control target key start
LH: loop header
LB: loop body
LE: loop exit
PB: predicated region body
PF: predicated region fallthrough
CT: control target
= control target key end

     0   :  { %s22_s0 = inlined_call_operand.vmem [shape: f32[48], index: 0, kind: input, shape index: {}]   ;;  %s23_s1 = inlined_call_operand.vmem [shape: f32[4,48], index: 1, kind: output, shape index: {}]  }
   0x1   :  { %v4_v0 = vld [vmem:[%s22_s0] ss:$0 sm:$0xff] }
   0x2   :  { %5 = vst [vmem:[%s23_s1] sm:$0xf] %v4_v0 }

// kernel: tile.27
= control target key start
LH: loop header
LB: loop body
LE: loop exit
PB: predicated region body
PF: predicated region fallthrough
CT: control target
= control target key end

     0   :  { %vm14_vm0 = vcmask 261120   ;;  %vm8_vm1 = vcmask 392192   ;;  %s48_s8 = smov 96   ;;  %s49_s9 = smov 48   ;;  %vm18_vm2 = vcmask 130048   ;;  %vm21_vm3 = vcmask 1048320   ;;  %s66_s0 = inlined_call_operand.vmem [shape: f32[4,48], index: 0, kind: input, shape index: {}]   ;;  %s67_s1 = inlined_call_operand.vmem [shape: f32[192], index: 1, kind: output, shape index: {}]  }
   0x1   :  { %v5_v0 = vld [vmem:[%s66_s0] sm:$0xf]  ;;  %s47_s0 = smov 16   ;;  %vm33_vm4 = vcmask 523392   ;;  %vm27_vm5 = vcmask 785792  }
   0x2   :  { %6 = vst [vmem:[#allocation1] sm:$0xf] %v5_v0 }
   0x9   :  { %v11_v1 = vld [vmem:[#allocation1 + $0x2] sm:$0x1]   ;;  %v30_v3 = vld [vmem:[#allocation1 + $0x3] sm:$0x1]   ;;  %v7_v5 = vld [vmem:[#allocation1] sm:$0x1]  }
   0xa   :  { %v13_v2 = vld [vmem:[#allocation1 + $0x2] sm:$0x1]   ;;  %31 = vrot.lane.b32.xlu1 %v30_v3, %s47_s0  ;;  %9 = vst.msk [vmem:[#allocation0] sm:$0x1] %vm8_vm1, %v7_v5   ;;  %v24_v6 = vld [vmem:[#allocation1 + $0x1] sm:$0x1]  }
   0xb   :  { %v15_v4 = vsel %vm14_vm0, %v13_v2, %v11_v1 }
   0xc   :  { %16 = vrot.lane.b32.xlu0 %v15_v4, %s48_s8 }
  0x10   :  { %25 = vrot.lane.b32.xlu0 %v24_v6, %s49_s9 }
  0x7c   :  { %v32_v7 = vpop.permute.xlu1 %31  }
  0x7e   :  { %v17_v8 = vpop.permute.xlu0 %16  }
  0x7f   :  { %20 = vst.msk [vmem:[#allocation0 + $0x1] sm:$0x1] %vm18_vm2, %v17_v8  }
  0x80   :  { %22 = vst.msk [vmem:[#allocation0] sm:$0x1] %vm21_vm3, %v17_v8  }
  0x81   :  { %35 = vst.msk [vmem:[#allocation0 + $0x1] sm:$0x1] %vm33_vm4, %v32_v7  }
  0x82   :  { %v26_v9 = vpop.permute.xlu0 %25  }
  0x83   :  { %28 = vst.msk [vmem:[#allocation0] sm:$0x1] %vm27_vm5, %v26_v9  }
  0x8a   :  { %v40_v10 = vld [vmem:[#allocation0] sm:$0x3] }
  0x8b   :  { %43 = vst [vmem:[%s67_s1] sm:$0x3] %v40_v10 }

// kernel: tile.25
= control target key start
LH: loop header
LB: loop body
LE: loop exit
PB: predicated region body
PF: predicated region fallthrough
CT: control target
= control target key end

     0   :  { %s108_s12 = smov 36   ;;  %vm17_vm0 = vcmask 31744   ;;  %s109_s13 = smov 40   ;;  %vm23_vm1 = vcmask 392544   ;;  %vm29_vm2 = vcmask 359744   ;;  %vm35_vm3 = vcmask 326944   ;;  %s140_s0 = inlined_call_operand.vmem [shape: f32[3,4,4], index: 0, kind: input, shape index: {}]   ;;  %s141_s1 = inlined_call_operand.vmem [shape: f32[48], index: 1, kind: output, shape index: {}]  }
   0x1   :  { %v94_v0 = vld [vmem:[%s140_s0 + $0x8] sm:$0xf]  ;;  %v95_v1 = vld [vmem:[%s140_s0 + $0x4] sm:$0xf]  ;;  %v14_v2 = vld [vmem:[%s140_s0] sm:$0xf] }
   0x2   :  { %9 = vst [vmem:[#allocation1 + $0x10] sm:$0xf] %v94_v0  ;;  %13 = vst [vmem:[#allocation1 + $0x8] sm:$0xf] %v95_v1  ;;  %s107_s0 = smov 44   ;;  %s110_s14 = smov 32  }
   0x3   :  { %15 = vst [vmem:[#allocation1] sm:$0xf] %v14_v2  ;;  %s111_s15 = smov 28   ;;  %s112_s16 = smov 24   ;;  %vm41_vm4 = vcmask 294144   ;;  %vm47_vm5 = vcmask 261344  }
   0x4   :  { %s113_s17 = smov 20   ;;  %s114_s18 = smov 16   ;;  %vm53_vm6 = vcmask 228544   ;;  %vm59_vm7 = vcmask 195744   ;;  %vm65_vm8 = vcmask 162944   ;;  %vm71_vm9 = vcmask 130144  }
   0x5   :  { %s115_s19 = smov 12   ;;  %s116_s20 = smov 8   ;;  %vm77_vm10 = vcmask 97344   ;;  %vm83_vm11 = vcmask 64544  }
   0x6   :  { %s117_s21 = smov 4  }
   0x9   :  { %v20_v3 = vld [vmem:[#allocation1 + $0x13] sm:$0x1]   ;;  %v32_v4 = vld [vmem:[#allocation1 + $0x11] sm:$0x1]   ;;  %v26_v5 = vld [vmem:[#allocation1 + $0x12] sm:$0x1]  }
   0xa   :  { %21 = vrot.lane.b32.xlu0 %v20_v3, %s107_s0  ;;  %33 = vrot.lane.b32.xlu1 %v32_v4, %s108_s12  ;;  %v38_v6 = vld [vmem:[#allocation1 + $0x10] sm:$0x1]   ;;  %v16_v7 = vld [vmem:[#allocation1] sm:$0x1]   ;;  %v44_v8 = vld [vmem:[#allocation1 + $0xb] sm:$0x1]  }
   0xb   :  { %18 = vst.msk [vmem:[#allocation0] sm:$0x1] %vm17_vm0, %v16_v7   ;;  %v50_v9 = vld [vmem:[#allocation1 + $0xa] sm:$0x1]   ;;  %v56_v10 = vld [vmem:[#allocation1 + $0x9] sm:$0x1]  }
   0xc   :  { %v62_v11 = vld [vmem:[#allocation1 + $0x8] sm:$0x1]   ;;  %v68_v12 = vld [vmem:[#allocation1 + $0x3] sm:$0x1]   ;;  %v74_v13 = vld [vmem:[#allocation1 + $0x2] sm:$0x1]  }
   0xd   :  { %v80_v14 = vld [vmem:[#allocation1 + $0x1] sm:$0x1]  }
   0xe   :  { %27 = vrot.lane.b32.xlu0 %v26_v5, %s109_s13  ;;  %39 = vrot.lane.b32.xlu1 %v38_v6, %s110_s14 }
  0x12   :  { %45 = vrot.lane.b32.xlu0 %v44_v8, %s111_s15  ;;  %51 = vrot.lane.b32.xlu1 %v50_v9, %s112_s16 }
  0x16   :  { %57 = vrot.lane.b32.xlu0 %v56_v10, %s113_s17  ;;  %63 = vrot.lane.b32.xlu1 %v62_v11, %s114_s18 }
  0x1a   :  { %69 = vrot.lane.b32.xlu0 %v68_v12, %s115_s19  ;;  %75 = vrot.lane.b32.xlu1 %v74_v13, %s116_s20 }
  0x1e   :  { %81 = vrot.lane.b32.xlu0 %v80_v14, %s117_s21 }
  0x7c   :  { %v22_v15 = vpop.permute.xlu0 %21   ;;  %v34_v16 = vpop.permute.xlu1 %33  }
  0x7d   :  { %24 = vst.msk [vmem:[#allocation0] sm:$0x1] %vm23_vm1, %v22_v15  }
  0x80   :  { %v28_v17 = vpop.permute.xlu0 %27   ;;  %v40_v18 = vpop.permute.xlu1 %39  }
  0x81   :  { %30 = vst.msk [vmem:[#allocation0] sm:$0x1] %vm29_vm2, %v28_v17  }
  0x82   :  { %36 = vst.msk [vmem:[#allocation0] sm:$0x1] %vm35_vm3, %v34_v16  }
  0x83   :  { %42 = vst.msk [vmem:[#allocation0] sm:$0x1] %vm41_vm4, %v40_v18  }
  0x84   :  { %v46_v19 = vpop.permute.xlu0 %45   ;;  %v52_v20 = vpop.permute.xlu1 %51  }
  0x85   :  { %48 = vst.msk [vmem:[#allocation0] sm:$0x1] %vm47_vm5, %v46_v19  }
  0x86   :  { %54 = vst.msk [vmem:[#allocation0] sm:$0x1] %vm53_vm6, %v52_v20  }
  0x88   :  { %v58_v21 = vpop.permute.xlu0 %57   ;;  %v64_v22 = vpop.permute.xlu1 %63  }
  0x89   :  { %60 = vst.msk [vmem:[#allocation0] sm:$0x1] %vm59_vm7, %v58_v21  }
  0x8a   :  { %66 = vst.msk [vmem:[#allocation0] sm:$0x1] %vm65_vm8, %v64_v22  }
  0x8c   :  { %v70_v23 = vpop.permute.xlu0 %69   ;;  %v76_v24 = vpop.permute.xlu1 %75  }
  0x8d   :  { %72 = vst.msk [vmem:[#allocation0] sm:$0x1] %vm71_vm9, %v70_v23  }
  0x8e   :  { %78 = vst.msk [vmem:[#allocation0] sm:$0x1] %vm77_vm10, %v76_v24  }
  0x90   :  { %v82_v25 = vpop.permute.xlu0 %81  }
  0x91   :  { %84 = vst.msk [vmem:[#allocation0] sm:$0x1] %vm83_vm11, %v82_v25  }
  0x98   :  { %v89_v26 = vld [vmem:[#allocation0] sm:$0x1] }
  0x99   :  { %92 = vst [vmem:[%s141_s1] sm:$0x1] %v89_v26 }

// kernel: lightweight_decoder_forward.1
= control target key start
LH: loop header
LB: loop body
LE: loop exit
PB: predicated region body
PF: predicated region fallthrough
CT: control target
= control target key end

     0   :  { %s909_s24 = smov 0   ;;  %s1017_s0 = inlined_call_operand.vmem [shape: bf16[32,32], index: 0, kind: input, shape index: {}]   ;;  %s1018_s1 = inlined_call_operand.vmem [shape: bf16[32,128], index: 1, kind: input, shape index: {}]   ;;  %s1019_s2 = inlined_call_operand.vmem [shape: f32[1,128], index: 2, kind: input, shape index: {}]   ;;  %s1020_s3 = inlined_call_operand.vmem [shape: bf16[128,128], index: 3, kind: input, shape index: {}]   ;;  %s1021_s4 = inlined_call_operand.vmem [shape: f32[1,128], index: 4, kind: input, shape index: {}]   ;;  %s1022_s5 = inlined_call_operand.vmem [shape: bf16[128,256], index: 5, kind: input, shape index: {}]   ;;  %s1023_s6 = inlined_call_operand.vmem [shape: f32[1,256], index: 6, kind: input, shape index: {}]   ;;  %s1024_s7 = inlined_call_operand.vmem [shape: bf16[32,256], index: 7, kind: output, shape index: {}]  }
   0x1 LB: > { %s717_s25 = sadd.s32 4294967295, %s864_s24   ;;  %p721_p0 = scmp.ge.s32.totalorder %s864_s24, 1  ;;  %s864_s24 = sphi %s909_s24, %s17_s24  }
   0x2   : > { %p238_p1 = scmp.lt.s32.totalorder %s864_s24, 3 }
   0x4   : > { %p239_p2 = pnand %p721_p0, %p238_p1 }
   0x5   : > { %s722_s30 = sshll.u32 (!%p239_p2), %s717_s25, 1 }
   0x6   : > { %242 = sbr.rel (%p239_p2) target bundleno = 666 (0x29a), region = 48  ;;  %p272_p3 = scmp.lt.s32.totalorder (!%p239_p2), %s722_s30, 3 }
   0xb   : > { %v815_v0 = vld [vmem:[%s1018_s1 + $0x8] sm:$0xff]   ;;  %v866_v1 = vmov 0.0   ;;  %v816_v2 = vld [vmem:[%s1018_s1] sm:$0xff]   ;;  %vm867_vm0 = vmmov 0   ;;  %vm315_vm1 = vcmask 261120   ;;  %v818_v3 = vld [vmem:[%s1020_s3 + $0x38] sm:$0xff]  }
   0xc   : > { %776 = vmatprep.subr.bf16.mxu0 %v866_v1  ;;  %784 = vmatprep.subr.bf16.mxu1 %v866_v1  ;;  %s1026_s30 = smov (!%p272_p3, %s722_s30), 3  ;;  %v819_v5 = vld [vmem:[%s1020_s3 + $0x30] sm:$0xff]   ;;  %v820_v6 = vld [vmem:[%s1020_s3 + $0x28] sm:$0xff]   ;;  %v821_v7 = vld [vmem:[%s1020_s3 + $0x20] sm:$0xff]   ;;  %v868_v46 = vmov 0  }
   0xd   : > { %777 = vmatpush3.bf16.msra.mxu0 %v815_v0  ;;  %780 = vmatprep.mubr.msk.bf16.mxu0 %vm867_vm0, %v866_v1  ;;  %s723_s10 = sshll.u32 %s1026_s30, 2  ;;  %v822_v8 = vld [vmem:[%s1020_s3 + $0x18] sm:$0xff]   ;;  %v823_v9 = vld [vmem:[%s1020_s3 + $0x10] sm:$0xff]   ;;  %v824_v10 = vld [vmem:[%s1020_s3 + $0x8] sm:$0xff]   ;;  %s761_s25 = sshll.u32 %s1026_s30, 3 }
   0xe   : > { %778 = vmatprep.subr.bf16.mxu0 %v866_v1  ;;  %800 = vmatprep.mubr.msk.bf16.mxu1 %vm867_vm0, %v866_v1  ;;  %s275_s13 = scalar_lea.vmem %s1017_s0, %s723_s10  ;;  %v825_v11 = vld [vmem:[%s1020_s3] sm:$0xff]   ;;  %v826_v12 = vld [vmem:[%s1022_s5 + $0x70] ss:$8 sps:$4 sm:$0xff]   ;;  %v828_v13 = vld [vmem:[%s1022_s5 + $0x74] ss:$8 sps:$4 sm:$0xff]   ;;  %s282_s28 = scalar_lea.vmem %s1024_s7, %s761_s25 }
   0xf   : > { %785 = vmatpush3.bf16.msra.mxu1 %v818_v3  ;;  %v817_v4 = vld [vmem:[%s275_s13] sm:$0xff]   ;;  %v834_v34 = vld [vmem:[%s1022_s5 + $0x54] ss:$8 sps:$4 sm:$0xff]   ;;  %v832_v35 = vld [vmem:[%s1022_s5 + $0x50] ss:$8 sps:$4 sm:$0xff]  }
  0x10   : > { %786 = vmatprep.subr.bf16.mxu1 %v866_v1  ;;  %v727_v14 = vld [vmem:[%s1019_s2] ss:$0 sm:$0xff]  ;;  %v831_v32 = vld [vmem:[%s1022_s5 + $0x64] ss:$8 sps:$4 sm:$0xff]   ;;  %v840_v38 = vld [vmem:[%s1022_s5 + $0x34] ss:$8 sps:$4 sm:$0xff]  }
  0x11   : > { %779 = vmatpush3.bf16.msra.mxu0 %v816_v2  ;;  %v829_v33 = vld [vmem:[%s1022_s5 + $0x60] ss:$8 sps:$4 sm:$0xff]   ;;  %v837_v36 = vld [vmem:[%s1022_s5 + $0x44] ss:$8 sps:$4 sm:$0xff]   ;;  %v838_v39 = vld [vmem:[%s1022_s5 + $0x30] ss:$8 sps:$4 sm:$0xff]  }
  0x12   : > { %602 = vmatprep.subr.bf16.mxu0 %v828_v13  ;;  %v835_v37 = vld [vmem:[%s1022_s5 + $0x40] ss:$8 sps:$4 sm:$0xff]   ;;  %v843_v40 = vld [vmem:[%s1022_s5 + $0x24] ss:$8 sps:$4 sm:$0xff]   ;;  %v846_v42 = vld [vmem:[%s1022_s5 + $0x14] ss:$8 sps:$4 sm:$0xff]  }
  0x13   : > { %787 = vmatpush3.bf16.msra.mxu1 %v819_v5  ;;  %v841_v41 = vld [vmem:[%s1022_s5 + $0x20] ss:$8 sps:$4 sm:$0xff]   ;;  %v844_v43 = vld [vmem:[%s1022_s5 + $0x10] ss:$8 sps:$4 sm:$0xff]   ;;  %v849_v44 = vld [vmem:[%s1022_s5 + $0x4] ss:$8 sps:$4 sm:$0xff]  }
  0x14   : > { %781 = vmatmul.mubr.msk.bf16.vlgmr.msra.gmra.mxu0 %vm315_vm1, %v817_v4  ;;  %788 = vmatprep.subr.bf16.mxu1 %v866_v1  ;;  %v847_v45 = vld [vmem:[%s1022_s5] ss:$8 sps:$4 sm:$0xff]  }
  0x15   : > { %603 = vmatpush1.bf16.msra.mxu0 %v826_v12  ;;  %634 = vmatprep.mubr.bf16.mxu0 %v868_v46  ;;  %v732_v47 = vld [vmem:[%s1021_s4] ss:$0 sm:$0xff] }
  0x16   : > { %604 = vmatprep.subr.bf16.mxu0 %v831_v32  ;;  %v510_v5 = vld [vmem:[%s1023_s6] sm:$0x3] }
  0x17   : > { %789 = vmatpush3.bf16.msra.mxu1 %v820_v6 }
  0x18   : > { %790 = vmatprep.subr.bf16.mxu1 %v866_v1 }
  0x19   : > { %605 = vmatpush1.bf16.msra.mxu0 %v829_v33 }
  0x1a   : > { %606 = vmatprep.subr.bf16.mxu0 %v834_v34 }
  0x1b   : > { %791 = vmatpush3.bf16.msra.mxu1 %v821_v7 }
  0x1c   : > { %792 = vmatprep.subr.bf16.mxu1 %v866_v1 }
  0x1d   : > { %607 = vmatpush1.bf16.msra.mxu0 %v832_v35 }
  0x1e   : > { %608 = vmatprep.subr.bf16.mxu0 %v837_v36 }
  0x1f   : > { %793 = vmatpush3.bf16.msra.mxu1 %v822_v8 }
  0x20   : > { %794 = vmatprep.subr.bf16.mxu1 %v866_v1 }
  0x21   : > { %609 = vmatpush1.bf16.msra.mxu0 %v835_v37 }
  0x22   : > { %610 = vmatprep.subr.bf16.mxu0 %v840_v38 }
  0x23   : > { %795 = vmatpush3.bf16.msra.mxu1 %v823_v9 }
  0x24   : > { %796 = vmatprep.subr.bf16.mxu1 %v866_v1 }
  0x25   : > { %611 = vmatpush1.bf16.msra.mxu0 %v838_v39 }
  0x26   : > { %612 = vmatprep.subr.bf16.mxu0 %v843_v40 }
  0x27   : > { %797 = vmatpush3.bf16.msra.mxu1 %v824_v10 }
  0x28   : > { %798 = vmatprep.subr.bf16.mxu1 %v866_v1  ;;  %v512_v1 = vlaneseq }
  0x29   : > { %613 = vmatpush1.bf16.msra.mxu0 %v841_v41 }
  0x2a   : > { %614 = vmatprep.subr.bf16.mxu0 %v846_v42  ;;  %v513_v2 = vshrl.u32 %v512_v1, 7 }
  0x2b   : > { %799 = vmatpush3.bf16.msra.mxu1 %v825_v11 }
  0x2c   : > { %v514_v3 = vsub.s32 0, %v513_v2  ;;  %v518_v4 = vsub.s32 1, %v513_v2 }
  0x2d   : > { %615 = vmatpush1.bf16.msra.mxu0 %v844_v43 }
  0x2e   : > { %616 = vmatprep.subr.bf16.mxu0 %v849_v44  ;;  %v515_v6 = vrot.slane %v510_v5, %v514_v3  ;;  %v519_v7 = vrot.slane %v510_v5, %v518_v4 }
  0x31   : > { %617 = vmatpush1.bf16.msra.mxu0 %v847_v45 }
  0xd4   : > { %v353_v15 = vpop.f32.mrf.mxu0 }
  0xd5   : > { %v354_v16 = vadd.f32 %v727_v14, %v353_v15 }
  0xd6   : > { %v782_v17 = vpop.f32.mrf.mxu0 }
  0xd7   : > { %v362_v18 = vmul.f32 0.70710677, %v354_v16  ;;  %v360_v26 = vmul.f32 0.5, %v354_v16 }
  0xd8   : > { %v356_v19 = vpop.f32.mrf.mxu0 }
  0xd9   : > { %850 = verf.f32 %v362_v18  ;;  %v357_v20 = vadd.f32 %v727_v14, %v356_v19 }
  0xda   : > { %v783_v21 = vpop.f32.mrf.mxu0 }
  0xdb   : > { %v363_v22 = vmul.f32 0.70710677, %v357_v20  ;;  %v361_v27 = vmul.f32 0.5, %v357_v20 }
  0xdd   : > { %852 = verf.f32 %v363_v22 }
  0xe6   : > { %v851_v23 = vpop.eup %850 }
  0xe7   : > { %v366_v24 = vadd.f32 1.0, %v851_v23 }
  0xe9   : > { %v368_v29 = vmul.f32 %v366_v24, %v360_v26 }
  0xea   : > { %v853_v25 = vpop.eup %852 }
  0xeb   : > { %v367_v28 = vadd.f32 1.0, %v853_v25 }
  0xed   : > { %v369_v30 = vmul.f32 %v367_v28, %v361_v27 }
  0xef   : > { %v370_v31 = vpack.c.bf16 %v369_v30, %v368_v29 }
  0xf1   : > { %801 = vmatmul.mubr.bf16.vlgmr.msra.gmra.mxu1 %v370_v31 }
 0x1b1   : > { %v476_v48 = vpop.f32.mrf.mxu1 }
 0x1b2   : > { %v477_v49 = vadd.f32 %v732_v47, %v476_v48 }
 0x1b3   : > { %v802_v50 = vpop.f32.mrf.mxu1 }
 0x1b4   : > { %v485_v51 = vmul.f32 0.70710677, %v477_v49  ;;  %v483_v59 = vmul.f32 0.5, %v477_v49 }
 0x1b5   : > { %v479_v52 = vpop.f32.mrf.mxu1 }
 0x1b6   : > { %854 = verf.f32 %v485_v51  ;;  %v480_v53 = vadd.f32 %v732_v47, %v479_v52 }
 0x1b7   : > { %v803_v54 = vpop.f32.mrf.mxu1 }
 0x1b8   : > { %v486_v55 = vmul.f32 0.70710677, %v480_v53  ;;  %v484_v60 = vmul.f32 0.5, %v480_v53 }
 0x1ba   : > { %856 = verf.f32 %v486_v55 }
 0x1c3   : > { %v855_v56 = vpop.eup %854 }
 0x1c4   : > { %v489_v57 = vadd.f32 1.0, %v855_v56 }
 0x1c6   : > { %v491_v62 = vmul.f32 %v489_v57, %v483_v59 }
 0x1c7   : > { %v857_v58 = vpop.eup %856 }
 0x1c8   : > { %v490_v61 = vadd.f32 1.0, %v857_v58 }
 0x1ca   : > { %v492_v63 = vmul.f32 %v490_v61, %v484_v60 }
 0x1cc   : > { %v493_v0 = vpack.c.bf16 %v492_v63, %v491_v62 }
 0x1ce   : > { %635 = vmatmul.mubr.bf16.vlgmr.msra.gmra.mxu0 %v493_v0 }
 0x28e   : > { %v636_v8 = vpop.f32.mrf.mxu0 }
 0x28f   : > { %v637_v10 = vadd.f32 %v636_v8, %v515_v6 }
 0x290   : > { %v638_v9 = vpop.f32.mrf.mxu0 }
 0x291   : > { %v639_v11 = vadd.f32 %v638_v9, %v519_v7 }
 0x292   : > { %v640_v12 = vpop.f32.mrf.mxu0 }
 0x293   : > { %v762_v13 = vpack.c.bf16 %v639_v11, %v637_v10  ;;  %v641_v15 = vadd.f32 %v640_v12, %v515_v6 }
 0x294   : > { %v642_v14 = vpop.f32.mrf.mxu0 }
 0x295   : > { %657 = vst [vmem:[%s282_s28] sm:$0xff] %v762_v13  ;;  %v643_v16 = vadd.f32 %v642_v14, %v519_v7 }
 0x297   : > { %v763_v17 = vpack.c.bf16 %v643_v16, %v641_v15 }
 0x299   : > { %658 = vst [vmem:[%s282_s28 + $0x8] sm:$0xff] %v763_v17 }
 0x29a PF: > { %s17_s24 = sadd.s32 1, %s864_s24  }
 0x29b   : > { %p14_p4 = scmp.ge.s32.totalorder %s17_s24, 4  }
 0x29d   :  { %16 = sbr.rel (!%p14_p4) target bundleno = 1 (0x1), region = 78 }

</bundles_post_ra>
